<compile_context>
chip_gen: v6e
topology: v6e:2x2x1
jax: 0.10.0
libtpu: 0.0.40
codegen_flags: <defaults>
</compile_context>

<pallas_src>
import jax
import jax.numpy as jnp
from jax.experimental import pallas as pl
from jax.experimental.pallas import tpu as pltpu


# ---------------------------------------------------------------------------
# Packed parameter slab layout (f32, shape (112, 128)):
#   rows   0: 24, cols 0: 4   -> fc1.weight   (24, 4)
#   rows  24: 48, cols 0:24   -> fc2.weight   (24, 24)
#   rows  48: 50, cols 0:24   -> head.weight  (2, 24)
#   rows  56: 80, col  0      -> fc1.bias     (24,)
#   rows  80:104, col  0      -> fc2.bias     (24,)
#   rows 104:106, col  0      -> head.bias    (2,)
# ---------------------------------------------------------------------------
_SLAB_SHAPE = (112, 128)


def _dqn_kernel(p_ref, x_ref, o_ref):
    # x_ref: (4, TB) f32, batch on lanes.
    xb = x_ref[...].astype(jnp.bfloat16)

    # Static, sublane-aligned slices of the resident parameter slab.
    w1 = p_ref[0:24, 0:4].astype(jnp.bfloat16)      # (24, 4)
    w2 = p_ref[24:48, 0:24].astype(jnp.bfloat16)    # (24, 24)
    w3 = p_ref[48:50, 0:24].astype(jnp.bfloat16)    # (2, 24)
    b1 = p_ref[56:80, 0:1]                          # (24, 1) f32
    b2 = p_ref[80:104, 0:1]                         # (24, 1) f32
    b3 = p_ref[104:106, 0:1]                        # (2, 1)  f32

    # fc1 + ReLU
    h1 = jnp.dot(w1, xb, preferred_element_type=jnp.float32) + b1   # (24, TB)
    h1 = jnp.maximum(h1, 0.0).astype(jnp.bfloat16)
    # fc2 + ReLU
    h2 = jnp.dot(w2, h1, preferred_element_type=jnp.float32) + b2   # (24, TB)
    h2 = jnp.maximum(h2, 0.0).astype(jnp.bfloat16)
    # head (no activation), lane-dense (2, TB) store
    o_ref[...] = jnp.dot(w3, h2, preferred_element_type=jnp.float32) + b3


def _round_up(n, m):
    return ((n + m - 1) // m) * m


def cartpole_dqn_forward(x, slab, *, tb=8192):
    """x: (B, 4) float32, slab: packed (112, 128) params -> (B, 2) float32."""
    B = x.shape[0]
    tb = _round_up(tb, 128)
    tb_eff = min(tb, _round_up(B, 128))          # lane tile, multiple of 128
    Bp = _round_up(B, tb_eff)                    # padded batch

    # Layout plumbing only: put batch on lanes and pad to the tile size.
    xt = jnp.zeros((4, Bp), jnp.float32).at[:, :B].set(x.T)

    out_t = pl.pallas_call(
        _dqn_kernel,
        out_shape=jax.ShapeDtypeStruct((2, Bp), jnp.float32),
        grid=(Bp // tb_eff,),
        in_specs=[
            pl.BlockSpec(_SLAB_SHAPE, lambda i: (0, 0)),   # params: fetched once
            pl.BlockSpec((4, tb_eff), lambda i: (0, i)),   # states: batch tile
        ],
        out_specs=pl.BlockSpec((2, tb_eff), lambda i: (0, i)),
        compiler_params=pltpu.CompilerParams(
            dimension_semantics=("parallel",),             # 2x on v7x megacore
        ),
    )(slab, xt)

    return out_t[:, :B].T                                  # back to (B, 2)


def init_params(key):
    """Mirror the PyTorch module: Xavier-uniform fc1/fc2 weights, 0.01 biases,
    default nn.Linear init for the head. Weights kept in (out, in) layout."""
    k1, k2, k3, k4 = jax.random.split(key, 4)

    def xavier(k, fan_out, fan_in):
        bound = (6.0 / (fan_in + fan_out)) ** 0.5
        return jax.random.uniform(k, (fan_out, fan_in), jnp.float32, -bound, bound)

    w1 = xavier(k1, 24, 4)
    b1 = jnp.full((24,), 0.01, jnp.float32)
    w2 = xavier(k2, 24, 24)
    b2 = jnp.full((24,), 0.01, jnp.float32)

    head_bound = 1.0 / (24.0 ** 0.5)
    w3 = jax.random.uniform(k3, (2, 24), jnp.float32, -head_bound, head_bound)
    b3 = jax.random.uniform(k4, (2,), jnp.float32, -head_bound, head_bound)
    return (w1, b1, w2, b2, w3, b3)


def pack_params(w1, b1, w2, b2, w3, b3):
    """Pack all parameters into a single (112, 128) f32 slab (one DMA)."""
    slab = jnp.zeros(_SLAB_SHAPE, jnp.float32)
    slab = slab.at[0:24, 0:4].set(w1)
    slab = slab.at[24:48, 0:24].set(w2)
    slab = slab.at[48:50, 0:24].set(w3)
    slab = slab.at[56:80, 0].set(b1)
    slab = slab.at[80:104, 0].set(b2)
    slab = slab.at[104:106, 0].set(b3)
    return slab


def reference_forward(x, params):
    w1, b1, w2, b2, w3, b3 = params
    h1 = jnp.maximum(x @ w1.T + b1, 0.0)
    h2 = jnp.maximum(h1 @ w2.T + b2, 0.0)
    return h2 @ w3.T + b3


if __name__ == "__main__":
    key = jax.random.PRNGKey(0)
    pkey, xkey, xkey2 = jax.random.split(key, 3)
    params = init_params(pkey)
    slab = pack_params(*params)

    # Batched states (exercises multi-step batch grid: tb=256 -> grid=(4,)).
    B = 1024
    x = jax.random.normal(xkey, (B, 4), jnp.float32)
    out = jax.block_until_ready(cartpole_dqn_forward(x, slab, tb=256))
    ref = reference_forward(x, params)
    assert out.shape == (B, 2), out.shape
    assert jnp.allclose(out, ref, atol=2e-2, rtol=2e-2), "mismatch vs reference (batched)"

    # Small-batch path (padded up to a single 128-lane tile).
    xs = jax.random.normal(xkey2, (8, 4), jnp.float32)
    outs = jax.block_until_ready(cartpole_dqn_forward(xs, slab))
    refs = reference_forward(xs, params)
    assert outs.shape == (8, 2), outs.shape
    assert jnp.allclose(outs, refs, atol=2e-2, rtol=2e-2), "mismatch vs reference (small batch)"

    print("KERNEL_OK")
</pallas_src>

<mosaic_0001>
module attributes {stable_mosaic.version = 11 : i64} {
  func.func @_dqn_kernel(%arg0: i32, %arg1: memref<112x128xf32, #tpu.memory_space<vmem>>, %arg2: memref<4x256xf32, #tpu.memory_space<vmem>>, %arg3: memref<2x256xf32, #tpu.memory_space<vmem>>) attributes {dimension_semantics = [#tpu.dimension_semantics<parallel>], iteration_bounds = array<i64: 4>, scalar_prefetch = 0 : i64, scratch_operands = 0 : i64, tpu.core_type = #tpu.core_type<tc>, window_params = [{pipeline_mode = #tpu.pipeline_mode<synchronous>, transform_indices = @transform_0, window_bounds = array<i64: 112, 128>}, {transform_indices = @transform_1, window_bounds = array<i64: 4, 256>}, {transform_indices = @transform_2, window_bounds = array<i64: 2, 256>}]} {
    %c0 = arith.constant 0 : index
    %c0_0 = arith.constant 0 : index
    %0 = vector.load %arg2[%c0, %c0_0] : memref<4x256xf32, #tpu.memory_space<vmem>>, vector<4x256xf32>
    %1 = arith.truncf %0 : vector<4x256xf32> to vector<4x256xbf16>
    %c0_1 = arith.constant 0 : index
    %c0_2 = arith.constant 0 : index
    %2 = vector.load %arg1[%c0_1, %c0_2] : memref<112x128xf32, #tpu.memory_space<vmem>>, vector<24x4xf32>
    %3 = arith.truncf %2 : vector<24x4xf32> to vector<24x4xbf16>
    %c24 = arith.constant 24 : index
    %c0_3 = arith.constant 0 : index
    %4 = vector.load %arg1[%c24, %c0_3] : memref<112x128xf32, #tpu.memory_space<vmem>>, vector<24x24xf32>
    %5 = arith.truncf %4 : vector<24x24xf32> to vector<24x24xbf16>
    %c48 = arith.constant 48 : index
    %c0_4 = arith.constant 0 : index
    %6 = vector.load %arg1[%c48, %c0_4] : memref<112x128xf32, #tpu.memory_space<vmem>>, vector<2x24xf32>
    %7 = arith.truncf %6 : vector<2x24xf32> to vector<2x24xbf16>
    %c56 = arith.constant 56 : index
    %c0_5 = arith.constant 0 : index
    %8 = vector.load %arg1[%c56, %c0_5] : memref<112x128xf32, #tpu.memory_space<vmem>>, vector<24x1xf32>
    %c80 = arith.constant 80 : index
    %c0_6 = arith.constant 0 : index
    %9 = vector.load %arg1[%c80, %c0_6] : memref<112x128xf32, #tpu.memory_space<vmem>>, vector<24x1xf32>
    %c104 = arith.constant 104 : index
    %c0_7 = arith.constant 0 : index
    %10 = vector.load %arg1[%c104, %c0_7] : memref<112x128xf32, #tpu.memory_space<vmem>>, vector<2x1xf32>
    %cst = arith.constant dense<0.000000e+00> : vector<24x256xf32>
    %11 = tpu.matmul %3, %1, %cst {dimension_numbers = #tpu.dot_dimension_numbers<[1], [0], [0], [1], [0, 0, 1, 1], [], []>} : vector<24x4xbf16>, vector<4x256xbf16>, vector<24x256xf32> -> vector<24x256xf32>
    %12 = vector.broadcast %8 : vector<24x1xf32> to vector<24x256xf32>
    %13 = arith.addf %11, %12 : vector<24x256xf32>
    %cst_8 = arith.constant 0.000000e+00 : f32
    %14 = vector.broadcast %cst_8 : f32 to vector<24x256xf32>
    %15 = arith.maximumf %13, %14 : vector<24x256xf32>
    %16 = arith.truncf %15 : vector<24x256xf32> to vector<24x256xbf16>
    %cst_9 = arith.constant dense<0.000000e+00> : vector<24x256xf32>
    %17 = tpu.matmul %5, %16, %cst_9 {dimension_numbers = #tpu.dot_dimension_numbers<[1], [0], [0], [1], [0, 0, 1, 1], [], []>} : vector<24x24xbf16>, vector<24x256xbf16>, vector<24x256xf32> -> vector<24x256xf32>
    %18 = vector.broadcast %9 : vector<24x1xf32> to vector<24x256xf32>
    %19 = arith.addf %17, %18 : vector<24x256xf32>
    %cst_10 = arith.constant 0.000000e+00 : f32
    %20 = vector.broadcast %cst_10 : f32 to vector<24x256xf32>
    %21 = arith.maximumf %19, %20 : vector<24x256xf32>
    %22 = arith.truncf %21 : vector<24x256xf32> to vector<24x256xbf16>
    %cst_11 = arith.constant dense<0.000000e+00> : vector<2x256xf32>
    %23 = tpu.matmul %7, %22, %cst_11 {dimension_numbers = #tpu.dot_dimension_numbers<[1], [0], [0], [1], [0, 0, 1, 1], [], []>} : vector<2x24xbf16>, vector<24x256xbf16>, vector<2x256xf32> -> vector<2x256xf32>
    %24 = vector.broadcast %10 : vector<2x1xf32> to vector<2x256xf32>
    %25 = arith.addf %23, %24 : vector<2x256xf32>
    %c0_12 = arith.constant 0 : index
    %c0_13 = arith.constant 0 : index
    %26 = vector.load %arg3[%c0_12, %c0_13] : memref<2x256xf32, #tpu.memory_space<vmem>>, vector<2x256xf32>
    tpu.vector_store %arg3[%c0_12, %c0_13], %25 {strides = array<i32>} : memref<2x256xf32, #tpu.memory_space<vmem>>, vector<2x256xf32>,
    return
  }
  func.func @transform_0(%arg0: i32) -> (i32, i32) {
    %c0_i32 = arith.constant 0 : i32
    %c0_i32_0 = arith.constant 0 : i32
    %c0_i32_1 = arith.constant 0 : i32
    return %c0_i32, %c0_i32_0 : i32, i32
  }
  func.func @transform_1(%arg0: i32) -> (i32, i32) {
    %c0_i32 = arith.constant 0 : i32
    %c0_i32_0 = arith.constant 0 : i32
    return %c0_i32, %arg0 : i32, i32
  }
  func.func @transform_2(%arg0: i32) -> (i32, i32) {
    %c0_i32 = arith.constant 0 : i32
    %c0_i32_0 = arith.constant 0 : i32
    return %c0_i32, %arg0 : i32, i32
  }
}

</mosaic_0001>

<bundles_post_ra>
// kernel: tpu_custom_call.1
= control target key start
LH: loop header
LB: loop body
LE: loop exit
PB: predicated region body
PF: predicated region fallthrough
CT: control target
= control target key end

     0   :  { %7 = vsyncpa [#allocation3], 0  ;;  %s955_s0 = inlined_call_operand.hbm [shape: f32[112,128], index: 0, kind: input, shape index: {}]   ;;  %s956_s1 = inlined_call_operand.hbm [shape: f32[4,1024], index: 1, kind: input, shape index: {}]   ;;  %s957_s2 = inlined_call_operand.hbm [shape: f32[2,1024], index: 2, kind: output, shape index: {}]  }
   0x1   :  { %8 = vsyncpa [#allocation6], 0 }
   0x2   :  { %10 = vsyncpa [#allocation6 + $0x1], 0 }
   0x3   :  { %11 = vsyncpa [#allocation4], 0 }
   0x4   :  { %13 = vsyncpa [#allocation4 + $0x1], 0  ;;  %s782_s9 = smov 0   ;;  %s784_s10 = smov 0  }
   0x5   :  { %s786_s11 = smov 0   ;;  %s788_s12 = smov 0  }
   0x6 LB: > { %s803_s13 = sadd.s32 4294967295, %s759_s12   ;;  %s547_s14 = sadd.s32 4294967294, %s759_s12   ;;  %s759_s12 = sphi %s788_s12, %s978_s12   ;;  %s755_s11 = sphi %s786_s11, %s977_s11   ;;  %s751_s10 = sphi %s784_s10, %s976_s10   ;;  %s747_s9 = sphi %s782_s9, %s975_s9  }
   0x7   : > { %p60_p0 = scmp.ne.s32.totalorder %s751_s10, %s747_s9  ;;  %p958_p1 = scmp.eq.s32.totalorder %s803_s13, 0 }
   0x8   : > { %p90_p3 = scmp.eq.s32.totalorder %s547_s14, 3  ;;  %p548_p5 = scmp.ge.s32.totalorder %s759_s12, 1 }
   0x9   : > { %p812_p4 = por %p958_p1, %p60_p0  ;;  %p97_p7 = scmp.lt.s32.totalorder %s759_s12, 5 }
   0xa   : > { %p817_p6 = por %p90_p3, %p60_p0  ;;  %s761_s18 = smov [#allocation2]  }
   0xb   : > { %s962_s15 = scalar_select %p812_p4, 1, 0 }
   0xc   : > { %s963_s16 = scalar_select %p817_p6, 1, 0 }
   0xd   : > { %p822_p8 = pnand %p548_p5, %p97_p7  ;;  %s109_s19 = sshll.u32 %s761_s18, 4  ;;  %s110_s19 = int_to_ptr.vmem [resolvable:$true] %s109_s19 }
   0xe   : > { %s835_s21 = sadd.s32 1, %s759_s12   ;;  %s47_s22 = sadd.s32 1, %s755_s11 }
   0xf   : > { %s964_s17 = scalar_select %p822_p8, 1, 0 }
  0x10   : > { %p582_p9 = pneg %p822_p8  ;;  %s44_s23 = ssub.s32 %s759_s12, %s835_s21 }
  0x11   : > { %s648_s24 = scalar_lea.vmem %s110_s19, 1792  ;;  %p656_p3 = scmp.lt.s32.totalorder %s110_s19, %s110_s19 }
  0x12   : > { %p830_p10 = pnand %p582_p9, %p958_p1  ;;  %p649_p12 = scmp.ne.s32.totalorder %s110_s19, %s648_s24 }
  0x13   : > { %p657_p5 = scmp.lt.s32.totalorder %s648_s24, %s648_s24 }
  0x14   : > { %p639_p11 = pneg %p830_p10 }
  0x15   : > { %p658_p7 = por %p657_p5, %p656_p3 }
  0x16   : > { %p651_p13 = pnand %p649_p12, %p639_p11 }
  0x18   : > { %p652_p0 = pneg %p651_p13 }
  0x1a   : > { %p659_p2 = pnand %p658_p7, %p652_p0 }
  0x1c   : > { %662 = shalt.err (!%p659_p2)
}
  0x1d   : > { %s762_s25 = smov 128   ;;  %s763_s26 = smov 8  }
  0x1e   : > { %585 = dma.hbm_to_vmem [thread:$0]  (!%p830_p10), %s955_s0, 1792, %s110_s19, [#allocation3], %s762_s25, %s762_s25, %s763_s26  }
  0x1f   : > { %p45_p9 = scmp.eq.s32.totalorder %s44_s23, 0  ;;  %p54_p11 = scmp.ne.s32.totalorder %s755_s11, %s751_s10 }
  0x20   : > { %p55_p12 = scmp.eq.s32.totalorder %s759_s12, 0  ;;  %p595_p2 = scmp.lt.s32.totalorder %s759_s12, 4 }
  0x21   : > { %s852_s29 = scalar_select %p45_p9, %s755_s11, %s47_s22  }
  0x22   : > { %p56_p13 = por %p55_p12, %p54_p11  ;;  %p966_p0 = scmp.eq.s32.totalorder %s803_s13, 3 }
  0x23   : > { %s123_s3 = sand.u32 1, %s755_s11   ;;  %s572_s4 = sshll.u32 %s759_s12, 7 }
  0x24   : > { %p856_p3 = por %p966_p0, %p54_p11  ;;  %s551_s5 = sshll.u32 %s123_s3, 3 }
  0x25   : > { %s865_s8 = scalar_lea.hbm %s956_s1, %s572_s4  ;;  %s127_s14 = scalar_lea.vmem [#allocation5], %s551_s5 }
  0x26   : > { %s967_s30 = scalar_select %p856_p3, 1, 0 }
  0x27   : > { %s135_s18 = sshll.u32 %s127_s14, 4  ;;  %p867_p10 = pnand %p595_p2, %p56_p13  ;;  %s136_s18 = int_to_ptr.vmem [resolvable:$true] %s135_s18 }
  0x28   : > { %s124_s20 = scalar_lea.sflag [#allocation6], %s123_s3  ;;  %s663_s22 = scalar_lea.hbm %s865_s8, 128 }
  0x29   : > { %p664_p5 = scmp.ne.s32.totalorder %s865_s8, %s663_s22  ;;  %p665_p7 = pneg %p867_p10 }
  0x2a   : > { %s668_s25 = scalar_lea.hbm %s956_s1, 512  ;;  %p669_p12 = scmp.lt.s32.totalorder %s865_s8, %s956_s1 }
  0x2b   : > { %p666_p9 = pnand %p665_p7, %p664_p5  ;;  %p670_p2 = scmp.lt.s32.totalorder %s668_s25, %s663_s22 }
  0x2d   : > { %p667_p11 = pneg %p666_p9  ;;  %p671_p13 = por %p670_p2, %p669_p12 }
  0x2f   : > { %p672_p0 = pnand %p671_p13, %p667_p11 }
  0x31   : > { %675 = shalt.err (!%p672_p0)
}
  0x32   : > { %s676_s28 = scalar_lea.vmem %s136_s18, 128  ;;  %s764_s3 = smov [#allocation5]  }
  0x33   : > { %p677_p1 = scmp.ne.s32.totalorder %s136_s18, %s676_s28  ;;  %s681_s4 = sshll.u32 %s764_s3, 4  ;;  %s682_s4 = int_to_ptr.vmem [resolvable:$false] %s681_s4 }
  0x34   : > { %s683_s5 = scalar_lea.vmem %s682_s4, 256  ;;  %p684_p5 = scmp.lt.s32.totalorder %s136_s18, %s682_s4 }
  0x35   : > { %p679_p6 = pnand %p677_p1, %p665_p7  ;;  %p685_p9 = scmp.lt.s32.totalorder %s683_s5, %s676_s28 }
  0x37   : > { %p680_p3 = pneg %p679_p6  ;;  %p686_p4 = por %p685_p9, %p684_p5 }
  0x39   : > { %p687_p8 = pnand %p686_p4, %p680_p3 }
  0x3b   : > { %690 = shalt.err (!%p687_p8)
}
  0x3c   : > { %589 = dma.hbm_to_vmem [thread:$0]  (!%p867_p10), %s865_s8, 128, %s136_s18, %s124_s20  }
  0x3d   : > { %p969_p11 = scmp.ne.s32.totalorder %s964_s17, 0 }
  0x3e   : > { %p970_p12 = scmp.eq.s32.totalorder (!%p969_p11), %s803_s13, 0 }
  0x3f   : > { %144 = sbr.rel (%p969_p11) target bundleno = 728 (0x2d8), region = 28 }
  0x44   : > { %734 = dma.done.wait (%p970_p12), [#allocation3], 1792   ;;  %p971_p1 = pmov %p970_p12 }
  0x45   : > { %s892_s6 = sand.u32 1, %s751_s10   ;;  %p972_p4 = scmp.ne.s32.totalorder %s962_s15, 0 }
  0x46   : > { %736 = vsyncadd (%p971_p1), [#allocation3], 4294965504  ;;  %s556_s7 = sshll.u32 %s892_s6, 3  ;;  %s151_s14 = scalar_lea.sflag [#allocation6], %s892_s6 }
  0x47   : > { %s154_s19 = scalar_lea.vmem [#allocation5], %s556_s7 }
  0x48   : > { %738 = dma.done.wait (%p972_p4), %s151_s14, 128  }
  0x49   : > { %740 = vsyncadd (%p972_p4), %s151_s14, 4294967168  ;;  %v765_v0 = vmov 0   ;;  %v178_v1 = vld [vmem:[%s154_s19] sm:$0xff]  ;;  %vm225_vm0 = vcmask 1041408   ;;  %v198_v4 = vld [vmem:[#allocation2 + $0x48] sm:$0xff]  ;;  %vm218_vm1 = vcmask 31744  }
  0x4a   : > { %264 = vmatprep.mubr.bf16.mxu0 %v765_v0  ;;  %634 = vset.pattern.permute.xlu0 %v765_v0  ;;  %v180_v2 = vcombine.high %v178_v1, %v178_v1  ;;  %v182_v3 = vpack.c.bf16 %v178_v1, %v178_v1  ;;  %v184_v5 = vld [vmem:[#allocation2] sm:$0xff]  ;;  %v185_v6 = vld [vmem:[#allocation2 + $0x8] sm:$0xff]  ;;  %v196_v10 = vld [vmem:[#allocation2 + $0x38] sm:$0xff]  ;;  %vm315_vm2 = vcmask 1043456   ;;  %vm308_vm3 = vcmask 195584   ;;  %s557_s15 = sshll.u32 %s892_s6, 2 }
  0x4b   : > { %635 = vset.pattern.permute.xlu1 %v765_v0  ;;  %354 = vmatprep.mubr.bf16.mxu1 %v765_v0  ;;  %v197_v7 = vld [vmem:[#allocation2 + $0x40] sm:$0xff]  ;;  %v187_v12 = vpack.c.bf16 %v185_v6, %v184_v5  ;;  %v199_v13 = vld [vmem:[#allocation2 + $0x50] sm:$0xff]  ;;  %v200_v14 = vld [vmem:[#allocation2 + $0x58] sm:$0xff]  ;;  %s573_s17 = sshll.u32 %s803_s13, 6  ;;  %s174_s8 = scalar_lea.vmem [#allocation7], %s557_s15 }
  0x4c   : > { %215 = vperm.xlu0 %634, %v198_v4   ;;  %v183_v8 = vpack.c.bf16 %v180_v2, %v180_v2  ;;  %v227_v9 = vsel %vm225_vm0, %v182_v3, 0  ;;  %210 = vperm.xlu1 %635, %v197_v7   ;;  %v201_v11 = vld [vmem:[#allocation2 + $0x60] sm:$0xff]  ;;  %v186_v15 = vld [vmem:[#allocation2 + $0x10] sm:$0xff]  ;;  %v202_v16 = vld [vmem:[#allocation2 + $0x68] sm:$0x3]  ;;  %s465_s18 = sshll.u32 %s174_s8, 4  ;;  %s919_s23 = scalar_lea.hbm %s957_s2, %s573_s17  ;;  %s466_s18 = int_to_ptr.vmem [resolvable:$true] %s465_s18 }
  0x4d   : > { %v188_v17 = vpack.c.bf16 %v186_v15, %v186_v15  ;;  %v189_v45 = vld [vmem:[#allocation2 + $0x18] sm:$0xff]  ;;  %v190_v46 = vld [vmem:[#allocation2 + $0x20] sm:$0xff]  ;;  %v191_v49 = vld [vmem:[#allocation2 + $0x28] sm:$0xff]  ;;  %s451_s24 = scalar_lea.sflag [#allocation4], %s892_s6  ;;  %s691_s25 = scalar_lea.vmem %s466_s18, 64 }
  0x4e   : > { %558 = vmatprep.subr.msk.bf16.mxu0 %vm225_vm0, %v183_v8  ;;  %v192_v48 = vpack.c.bf16 %v190_v46, %v189_v45  ;;  %v193_v50 = vpack.c.bf16 %v191_v49, %v191_v49  ;;  %p692_p6 = scmp.ne.s32.totalorder %s466_s18, %s691_s25  ;;  %p973_p8 = scmp.ne.s32.totalorder %s967_s30, 0 }
  0x4f   : > { %247 = vmatpush1.bf16.msra.mxu0 %v227_v9  ;;  %s766_s13 = smov [#allocation7]  }
  0x50   : > { %205 = vperm.xlu0 %634, %v196_v10   ;;  %305 = vperm.xlu1 %635, %v201_v11   ;;  %p693_p3 = pnand %p692_p6, %p973_p8  ;;  %s695_s26 = sshll.u32 %s766_s13, 4  ;;  %s696_s26 = int_to_ptr.vmem [resolvable:$false] %s695_s26 }
  0x51   : > { %s697_s27 = scalar_lea.vmem %s696_s26, 128  ;;  %p698_p7 = scmp.lt.s32.totalorder %s466_s18, %s696_s26 }
  0x52   : > { %559 = vmatmul.mubr.msk.bf16.vlgmr.msra.gmra.mxu0 %vm218_vm1, %v187_v12  ;;  %p694_p10 = pneg %p693_p3  ;;  %p699_p2 = scmp.lt.s32.totalorder %s697_s27, %s691_s25 }
  0x53   : > { %274 = vmatprep.mubr.bf16.mxu0 %v765_v0 }
  0x54   : > { %295 = vperm.xlu0 %634, %v199_v13   ;;  %300 = vperm.xlu1 %635, %v200_v14   ;;  %v194_v14 = vld [vmem:[#allocation2 + $0x30] sm:$0x3]  ;;  %p700_p13 = por %p699_p2, %p698_p7 }
  0x56   : > { %p701_p0 = pnand %p700_p13, %p694_p10 }
  0x58   : > { %385 = vperm.xlu0 %634, %v202_v16   ;;  %v195_v16 = vpack.c.bf16 %v194_v14, %v194_v14 }
  0x5a   : > { %560 = vmatmul.mubr.msk.bf16.gmra.mxu0 %vm218_vm1, %v188_v17 }
  0x5b   : > { %429 = vmatprep.mubr.bf16.mxu0 %v765_v0 }
  0xc7   : > { %v216_v20 = vpop.permute.xlu0 %215  ;;  %v211_v23 = vpop.permute.xlu1 %210 }
  0xcb   : > { %v206_v27 = vpop.permute.xlu0 %205  ;;  %v306_v52 = vpop.permute.xlu1 %305 }
  0xcf   : > { %v301_v56 = vpop.permute.xlu1 %300  ;;  %v296_v60 = vpop.permute.xlu0 %295 }
 0x112   : > { %v266_v18 = vpop.f32.mrf.mxu0 }
 0x113   : > { %v267_v37 = vadd.f32 %v266_v18, %v206_v27  ;;  %v386_v18 = vpop.permute.xlu0 %385 }
 0x114   : > { %v268_v19 = vpop.f32.mrf.mxu0 }
 0x115   : > { %v269_v29 = vadd.f32 %v268_v19, %v206_v27  ;;  %v283_v44 = vmax.f32 %v267_v37, 0.0 }
 0x116   : > { %v270_v21 = vpop.f32.mrf.mxu0 }
 0x117   : > { %v271_v32 = vadd.f32 %v270_v21, %v211_v23  ;;  %v284_v39 = vmax.f32 %v269_v29, 0.0 }
 0x118   : > { %v272_v22 = vpop.f32.mrf.mxu0 }
 0x119   : > { %v273_v25 = vadd.f32 %v272_v22, %v211_v23  ;;  %v285_v41 = vmax.f32 %v271_v32, 0.0 }
 0x11a   : > { %v276_v24 = vpop.f32.mrf.mxu0 }
 0x11b   : > { %v277_v26 = vadd.f32 %v276_v24, %v216_v20  ;;  %v286_v34 = vmax.f32 %v273_v25, 0.0  ;;  %v289_v47 = vpack.c.bf16 %v285_v41, %v283_v44 }
 0x11c   : > { %v278_v28 = vpop.f32.mrf.mxu0 }
 0x11d   : > { %v287_v30 = vmax.f32 %v277_v26, 0.0  ;;  %v279_v31 = vadd.f32 %v278_v28, %v216_v20  ;;  %v290_v42 = vpack.c.bf16 %v286_v34, %v284_v39 }
 0x11e   : > { %v280_v33 = vpop.f32.mrf.mxu0 }
 0x11f   : > { %v291_v35 = vpack.c.bf16 %v287_v30, %v287_v30  ;;  %v288_v36 = vmax.f32 %v279_v31, 0.0 }
 0x120   : > { %v281_v38 = vpop.f32.mrf.mxu0 }
 0x121   : > { %v292_v40 = vpack.c.bf16 %v288_v36, %v288_v36  ;;  %v317_v43 = vsel %vm315_vm2, %v291_v35, 0 }
 0x123   : > { %561 = vmatprep.subr.msk.bf16.mxu1 %vm315_vm2, %v292_v40 }
 0x124   : > { %335 = vmatpush1.bf16.msra.mxu1 %v317_v43 }
 0x125   : > { %336 = vmatprep.subr.bf16.mxu1 %v290_v42 }
 0x128   : > { %337 = vmatpush1.bf16.msra.mxu1 %v289_v47 }
 0x12b   : > { %562 = vmatmul.mubr.msk.bf16.vlgmr.msra.gmra.mxu1 %vm308_vm3, %v192_v48 }
 0x12c   : > { %364 = vmatprep.mubr.bf16.mxu1 %v765_v0 }
 0x133   : > { %563 = vmatmul.mubr.msk.bf16.gmra.mxu1 %vm308_vm3, %v193_v50 }
 0x1eb   : > { %v356_v51 = vpop.f32.mrf.mxu1 }
 0x1ec   : > { %v357_v6 = vadd.f32 %v356_v51, %v296_v60 }
 0x1ed   : > { %v358_v53 = vpop.f32.mrf.mxu1 }
 0x1ee   : > { %v359_v62 = vadd.f32 %v358_v53, %v296_v60  ;;  %v373_v13 = vmax.f32 %v357_v6, 0.0 }
 0x1ef   : > { %v360_v54 = vpop.f32.mrf.mxu1 }
 0x1f0   : > { %v361_v2 = vadd.f32 %v360_v54, %v301_v56  ;;  %v374_v8 = vmax.f32 %v359_v62, 0.0 }
 0x1f1   : > { %v362_v55 = vpop.f32.mrf.mxu1 }
 0x1f2   : > { %v363_v58 = vadd.f32 %v362_v55, %v301_v56  ;;  %v375_v10 = vmax.f32 %v361_v2, 0.0 }
 0x1f3   : > { %v366_v57 = vpop.f32.mrf.mxu1 }
 0x1f4   : > { %v367_v59 = vadd.f32 %v366_v57, %v306_v52  ;;  %v376_v3 = vmax.f32 %v363_v58, 0.0  ;;  %v379_v15 = vpack.c.bf16 %v375_v10, %v373_v13 }
 0x1f5   : > { %v368_v61 = vpop.f32.mrf.mxu1 }
 0x1f6   : > { %v377_v63 = vmax.f32 %v367_v59, 0.0  ;;  %v369_v1 = vadd.f32 %v368_v61, %v306_v52  ;;  %v380_v11 = vpack.c.bf16 %v376_v3, %v374_v8 }
 0x1f7   : > { %v370_v0 = vpop.f32.mrf.mxu1 }
 0x1f8   : > { %v381_v4 = vpack.c.bf16 %v377_v63, %v377_v63  ;;  %v378_v5 = vmax.f32 %v369_v1, 0.0 }
 0x1f9   : > { %v371_v7 = vpop.f32.mrf.mxu1 }
 0x1fa   : > { %v382_v9 = vpack.c.bf16 %v378_v5, %v378_v5  ;;  %v392_v12 = vsel %vm315_vm2, %v381_v4, 0 }
 0x1fc   : > { %564 = vmatprep.subr.msk.bf16.mxu0 %vm315_vm2, %v382_v9 }
 0x1fd   : > { %410 = vmatpush1.bf16.msra.mxu0 %v392_v12 }
 0x1fe   : > { %411 = vmatprep.subr.bf16.mxu0 %v380_v11 }
 0x201   : > { %412 = vmatpush1.bf16.msra.mxu0 %v379_v15 }
 0x204   : > { %565 = vmatmul.mubr.msk.bf16.vlgmr.msra.gmra.mxu0 %vm308_vm3, %v195_v16 }
 0x2c4   : > { %v431_v17 = vpop.f32.mrf.mxu0 }
 0x2c5   : > { %v432_v20 = vadd.f32 %v431_v17, %v386_v18 }
 0x2c6   : > { %v433_v19 = vpop.f32.mrf.mxu0 }
 0x2c7   : > { %v434_v21 = vadd.f32 %v433_v19, %v386_v18 }
 0x2c8   : > { %v435_v22 = vpop.f32.mrf.mxu0 }
 0x2c9   : > { %v440_v23 = vcombine.low %v432_v20, %v434_v21 }
 0x2ca   : > { %v436_v24 = vpop.f32.mrf.mxu0 }
 0x2cb   : > { %566 = vst.sshfl [vmem:[%s174_s8] sm:$0x33 pattern:$0x76325410] %v440_v23 }
 0x2cc   : > { %704 = shalt.err (!%p701_p0)
}
 0x2cd   : > { %s705_s28 = scalar_lea.hbm %s919_s23, 64  ;;  %s709_s5 = scalar_lea.hbm %s957_s2, 256 }
 0x2ce   : > { %p706_p5 = scmp.ne.s32.totalorder %s919_s23, %s705_s28  ;;  %p710_p12 = scmp.lt.s32.totalorder %s919_s23, %s957_s2 }
 0x2cf   : > { %p711_p1 = scmp.lt.s32.totalorder %s709_s5, %s705_s28 }
 0x2d0   : > { %p707_p9 = pnand %p706_p5, %p973_p8 }
 0x2d1   : > { %p712_p4 = por %p711_p1, %p710_p12 }
 0x2d2   : > { %p708_p11 = pneg %p707_p9 }
 0x2d4   : > { %p713_p6 = pnand %p712_p4, %p708_p11 }
 0x2d6   : > { %716 = shalt.err (!%p713_p6)
}
 0x2d7   : > { %580 = dma.vmem_to_hbm [thread:$0]  (%p973_p8), %s466_s18, 64, %s919_s23, %s451_s24  }
 0x2d8 PF: > { %p597_p3 = scmp.ge.s32.totalorder %s759_s12, 2  ;;  %s477_s14 = sand.u32 1, %s747_s9  }
 0x2d9   : > { %p974_p10 = scmp.ne.s32.totalorder %s963_s16, 0  ;;  %s478_s19 = scalar_lea.sflag [#allocation4], %s477_s14 }
 0x2db   : > { %p591_p7 = pnand %p597_p3, %p974_p10 }
 0x2dd   : > { %p592_p2 = pneg %p591_p7 }
 0x2df   : > { %742 = dma.done.wait (%p592_p2), %s478_s19, 64  }
 0x2e0   : > { %744 = vsyncadd (%p592_p2), %s478_s19, 4294967232  ;;  %p16_p13 = scmp.ge.s32.totalorder %s835_s21, 6   ;;  %s975_s9 = smov %s751_s10 }
 0x2e1   : > { %s976_s10 = smov %s755_s11  ;;  %s977_s11 = smov %s852_s29 }
 0x2e2   : > { %s978_s12 = smov %s835_s21  ;;  %18 = sbr.rel (!%p16_p13) target bundleno = 6 (0x6), region = 78 }
 0x2e7   :  { %483 = vsyncpa [#allocation3], 1 }
 0x2e8   :  { %485 = vsyncpa [#allocation3 + $0x1], 1 }
 0x2e9   :  { %486 = vsyncpa [#allocation6], 1 }
 0x2ea   :  { %488 = vsyncpa [#allocation6 + $0x1], 1 }
 0x2eb   :  { %489 = vsyncpa [#allocation4], 1 }
 0x2ec   :  { %491 = vsyncpa [#allocation4 + $0x1], 1 }

</bundles_post_ra>
